<compile_context>
chip_gen: v5e
topology: v5e:2x2
jax: 0.10.0
libtpu: 0.0.40
codegen_flags: <defaults>
</compile_context>

<pallas_src>
import jax
import jax.numpy as jnp
from jax.experimental import pallas as pl
from jax.experimental.pallas import tpu as pltpu


def classify_net_kernel(x_ref, w1_ref, b1_ref, w2_ref, b2_ref, o_ref):
    """Fused 2-layer MLP head for one batch tile: relu(x@W1+b1) -> sigmoid(<h,w2>+b2)."""
    # input_layer + ReLU : (TB, D) @ (D, H) on the MXU, f32 accumulation.
    h = jnp.dot(x_ref[...], w1_ref[...], preferred_element_type=jnp.float32)  # (TB, H)
    h = jnp.maximum(h + b1_ref[...], 0.0)                                     # b1 is (1, H)
    # output_layer (out_features == 1): VPU multiply + lane reduction instead of
    # an N=1 MXU matmul; w2 is a (1, H) row, b2 is a scalar in SMEM.
    logit = jnp.sum(h * w2_ref[...], axis=-1, keepdims=True) + b2_ref[0]      # (TB, 1)
    o_ref[...] = jax.nn.sigmoid(logit).astype(o_ref.dtype)


def _round_up(x, m):
    return ((x + m - 1) // m) * m


def _choose_batch_tile(batch, feat_dim, itemsize, target_bytes=1 << 20):
    """Pick a batch tile: ~1 MB of x per tile, multiple of 8, capped by (padded) batch."""
    tb = max(8, target_bytes // max(1, feat_dim * itemsize))
    tb = (tb // 8) * 8
    tb = min(tb, _round_up(batch, 8))
    return max(tb, 8)


def classify_net_forward(node_vec, target_features, params):
    """Matches ClassifyNet.forward(node_vec, target_features) with target_embed_net=None."""
    del target_features  # unused: target_embed_net is None in the reference module
    w1, b1, w2_row, b2 = params  # w1:(D,H), b1:(1,H), w2_row:(1,H), b2:(1,)
    B, D = node_vec.shape
    H = w1.shape[1]
    itemsize = node_vec.dtype.itemsize

    TB = _choose_batch_tile(B, D, itemsize)
    B_pad = _round_up(B, TB)
    if B_pad != B:
        node_vec = jnp.pad(node_vec, ((0, B_pad - B), (0, 0)))

    grid = (B_pad // TB,)

    cost = pl.CostEstimate(
        flops=2 * B_pad * D * H + 2 * B_pad * H,
        transcendentals=B_pad,  # one sigmoid (exp) per row
        bytes_accessed=B_pad * D * itemsize + (D * H + 2 * H + 1) * 4 + B_pad * 4,
    )

    out = pl.pallas_call(
        classify_net_kernel,
        out_shape=jax.ShapeDtypeStruct((B_pad, 1), jnp.float32),
        grid_spec=pl.GridSpec(
            grid=grid,
            in_specs=[
                pl.BlockSpec((TB, D), lambda i: (i, 0)),        # x: tiled along batch
                pl.BlockSpec((D, H), lambda i: (0, 0)),         # W1: resident
                pl.BlockSpec((1, H), lambda i: (0, 0)),         # b1: resident
                pl.BlockSpec((1, H), lambda i: (0, 0)),         # W2 row: resident
                pl.BlockSpec(memory_space=pltpu.MemorySpace.SMEM),  # b2: scalar in SMEM
            ],
            out_specs=pl.BlockSpec((TB, 1), lambda i: (i, 0)),
        ),
        compiler_params=pltpu.CompilerParams(
            dimension_semantics=("parallel",)),  # megacore sharding on v7x
        cost_estimate=cost,
    )(node_vec, w1, b1, w2_row, b2)

    return out[:B]


def init_params(key, input_size, hidden_layer_size):
    """Deterministic synthetic init mimicking nn.Linear (uniform +/- 1/sqrt(fan_in))."""
    k1, k2, k3, k4 = jax.random.split(key, 4)
    lim1 = 1.0 / jnp.sqrt(input_size)
    lim2 = 1.0 / jnp.sqrt(hidden_layer_size)
    # Layer-1 weight stored transposed for the kernel: (in, out) layout.
    w1 = jax.random.uniform(k1, (input_size, hidden_layer_size),
                            minval=-lim1, maxval=lim1, dtype=jnp.float32)
    b1 = jax.random.uniform(k2, (1, hidden_layer_size),
                            minval=-lim1, maxval=lim1, dtype=jnp.float32)
    # Layer-2 weight stored as a (1, H) row for the VPU multiply+reduce.
    w2_row = jax.random.uniform(k3, (1, hidden_layer_size),
                                minval=-lim2, maxval=lim2, dtype=jnp.float32)
    b2 = jax.random.uniform(k4, (1,),
                            minval=-lim2, maxval=lim2, dtype=jnp.float32)
    return (w1, b1, w2_row, b2)


def reference_forward(node_vec, params):
    """Pure-JAX reference of the PyTorch forward for a correctness check."""
    w1, b1, w2_row, b2 = params
    h = jnp.maximum(node_vec @ w1 + b1, 0.0)
    return jax.nn.sigmoid(h @ w2_row.T + b2)


if __name__ == "__main__":
    key = jax.random.PRNGKey(0)
    k_x, k_t, k_p = jax.random.split(key, 3)

    batch = 8
    input_size = 32
    hidden = 32

    node_vec = jax.random.normal(k_x, (batch, input_size), dtype=jnp.float32)
    # target_features accepted by forward() but ignored (target_embed_net=None).
    target_features = jax.random.normal(k_t, (batch, input_size), dtype=jnp.float32)

    params = init_params(k_p, input_size, hidden)

    out = classify_net_forward(node_vec, target_features, params)
    out = jax.block_until_ready(out)

    ref = reference_forward(node_vec, params)
    assert out.shape == (batch, 1)
    assert jnp.allclose(out, ref, atol=1e-5, rtol=1e-5), "mismatch vs reference"

    print("KERNEL_OK")
</pallas_src>

<mosaic_0001>
module attributes {stable_mosaic.version = 11 : i64} {
  func.func @classify_net_kernel(%arg0: i32, %arg1: memref<8x32xf32, #tpu.memory_space<vmem>>, %arg2: memref<32x32xf32, #tpu.memory_space<vmem>>, %arg3: memref<1x32xf32, #tpu.memory_space<vmem>>, %arg4: memref<1x32xf32, #tpu.memory_space<vmem>>, %arg5: memref<1xf32, #tpu.memory_space<smem>>, %arg6: memref<8x1xf32, #tpu.memory_space<vmem>>) attributes {dimension_semantics = [#tpu.dimension_semantics<parallel>], iteration_bounds = array<i64: 1>, scalar_prefetch = 0 : i64, scratch_operands = 0 : i64, tpu.core_type = #tpu.core_type<tc>, window_params = [{transform_indices = @transform_0, window_bounds = array<i64: 8, 32>}, {pipeline_mode = #tpu.pipeline_mode<synchronous>, transform_indices = @transform_1, window_bounds = array<i64: 32, 32>}, {pipeline_mode = #tpu.pipeline_mode<synchronous>, transform_indices = @transform_2, window_bounds = array<i64: 1, 32>}, {pipeline_mode = #tpu.pipeline_mode<synchronous>, transform_indices = @transform_3, window_bounds = array<i64: 1, 32>}, {transform_indices = @transform_4, window_bounds = array<i64: 1>}, {transform_indices = @transform_5, window_bounds = array<i64: 8, 1>}]} {
    %c0 = arith.constant 0 : index
    %c0_0 = arith.constant 0 : index
    %0 = vector.load %arg1[%c0, %c0_0] : memref<8x32xf32, #tpu.memory_space<vmem>>, vector<8x32xf32>
    %c0_1 = arith.constant 0 : index
    %c0_2 = arith.constant 0 : index
    %1 = vector.load %arg2[%c0_1, %c0_2] : memref<32x32xf32, #tpu.memory_space<vmem>>, vector<32x32xf32>
    %cst = arith.constant dense<0.000000e+00> : vector<8x32xf32>
    %2 = tpu.matmul %0, %1, %cst {dimension_numbers = #tpu.dot_dimension_numbers<[1], [0], [0], [1], [0, 0, 1, 1], [], []>} : vector<8x32xf32>, vector<32x32xf32>, vector<8x32xf32> -> vector<8x32xf32>
    %c0_3 = arith.constant 0 : index
    %c0_4 = arith.constant 0 : index
    %3 = vector.load %arg3[%c0_3, %c0_4] : memref<1x32xf32, #tpu.memory_space<vmem>>, vector<1x32xf32>
    %4 = vector.broadcast %3 : vector<1x32xf32> to vector<8x32xf32>
    %5 = arith.addf %2, %4 : vector<8x32xf32>
    %cst_5 = arith.constant 0.000000e+00 : f32
    %6 = vector.broadcast %cst_5 : f32 to vector<8x32xf32>
    %7 = arith.maximumf %5, %6 : vector<8x32xf32>
    %c0_6 = arith.constant 0 : index
    %c0_7 = arith.constant 0 : index
    %8 = vector.load %arg4[%c0_6, %c0_7] : memref<1x32xf32, #tpu.memory_space<vmem>>, vector<1x32xf32>
    %9 = vector.broadcast %8 : vector<1x32xf32> to vector<8x32xf32>
    %10 = arith.mulf %7, %9 : vector<8x32xf32>
    %cst_8 = arith.constant dense<0.000000e+00> : vector<8xf32>
    %11 = vector.multi_reduction <add>, %10, %cst_8 [1] : vector<8x32xf32> to vector<8xf32>
    %12 = vector.shape_cast %11 : vector<8xf32> to vector<8x1xf32>
    %c0_9 = arith.constant 0 : index
    %13 = memref.load %arg5[%c0_9] : memref<1xf32, #tpu.memory_space<smem>>
    %14 = vector.broadcast %13 : f32 to vector<8x1xf32>
    %15 = arith.addf %12, %14 : vector<8x1xf32>
    %16 = arith.negf %15 : vector<8x1xf32>
    %17 = math.exp %16 : vector<8x1xf32>
    %cst_10 = arith.constant 1.000000e+00 : f32
    %18 = vector.broadcast %cst_10 : f32 to vector<8x1xf32>
    %19 = arith.addf %18, %17 : vector<8x1xf32>
    %20 = arith.divf %18, %19 : vector<8x1xf32>
    %c0_11 = arith.constant 0 : index
    %c0_12 = arith.constant 0 : index
    %21 = vector.load %arg6[%c0_11, %c0_12] : memref<8x1xf32, #tpu.memory_space<vmem>>, vector<8x1xf32>
    tpu.vector_store %arg6[%c0_11, %c0_12], %20 {strides = array<i32>} : memref<8x1xf32, #tpu.memory_space<vmem>>, vector<8x1xf32>,
    return
  }
  func.func @transform_0(%arg0: i32) -> (i32, i32) {
    %c0_i32 = arith.constant 0 : i32
    %c0_i32_0 = arith.constant 0 : i32
    return %arg0, %c0_i32 : i32, i32
  }
  func.func @transform_1(%arg0: i32) -> (i32, i32) {
    %c0_i32 = arith.constant 0 : i32
    %c0_i32_0 = arith.constant 0 : i32
    %c0_i32_1 = arith.constant 0 : i32
    return %c0_i32, %c0_i32_0 : i32, i32
  }
  func.func @transform_2(%arg0: i32) -> (i32, i32) {
    %c0_i32 = arith.constant 0 : i32
    %c0_i32_0 = arith.constant 0 : i32
    %c0_i32_1 = arith.constant 0 : i32
    return %c0_i32, %c0_i32_0 : i32, i32
  }
  func.func @transform_3(%arg0: i32) -> (i32, i32) {
    %c0_i32 = arith.constant 0 : i32
    %c0_i32_0 = arith.constant 0 : i32
    %c0_i32_1 = arith.constant 0 : i32
    return %c0_i32, %c0_i32_0 : i32, i32
  }
  func.func @transform_4(%arg0: i32) -> i32 {
    %c0_i32 = arith.constant 0 : i32
    %c0_i32_0 = arith.constant 0 : i32
    return %c0_i32 : i32
  }
  func.func @transform_5(%arg0: i32) -> (i32, i32) {
    %c0_i32 = arith.constant 0 : i32
    %c0_i32_0 = arith.constant 0 : i32
    return %arg0, %c0_i32 : i32, i32
  }
}

</mosaic_0001>

<bundles_post_ra>
// kernel: tpu_custom_call.1
= control target key start
LH: loop header
LB: loop body
LE: loop exit
PB: predicated region body
PF: predicated region fallthrough
CT: control target
= control target key end

     0   :  { %11 = vsyncpa [#allocation4], 0  ;;  %s239_s0 = inlined_call_operand.hbm [shape: f32[8,32], index: 0, kind: input, shape index: {}]   ;;  %s240_s1 = inlined_call_operand.hbm [shape: f32[32,32], index: 1, kind: input, shape index: {}]   ;;  %s241_s2 = inlined_call_operand.vmem [shape: f32[1,32], index: 2, kind: input, shape index: {}]   ;;  %s242_s3 = inlined_call_operand.vmem [shape: f32[1,32], index: 3, kind: input, shape index: {}]   ;;  %s243_s4 = inlined_call_operand.<no memory space> [shape: f32[1], index: 4, kind: input, shape index: {}]   ;;  %s244_s5 = inlined_call_operand.vmem [shape: f32[8,1], index: 5, kind: output, shape index: {}]  }
   0x1   :  { %s18_s20 = sshll.u32 %s239_s0, 4  ;;  %s19_s20 = int_to_ptr.hbm [resolvable:$true] %s18_s20 }
   0x2   :  { %12 = vsyncpa [#allocation6], 0  ;;  %s187_s21 = smov [#allocation3]   ;;  %s28_s25 = sshll.u32 %s240_s1, 4  ;;  %s29_s25 = int_to_ptr.hbm [resolvable:$true] %s28_s25 }
   0x3   :  { %s20_s22 = sshll.u32 %s187_s21, 4  ;;  %s188_s26 = smov [#allocation5]   ;;  %s21_s22 = int_to_ptr.vmem [resolvable:$true] %s20_s22 }
   0x4   :  { %23 = dma.hbm_to_vmem [thread:$0]  %s19_s20, 128, %s21_s22, [#allocation4]  }
   0x5   :  { %s30_s27 = sshll.u32 %s188_s26, 4  ;;  %s189_s28 = smov 128   ;;  %s31_s27 = int_to_ptr.vmem [resolvable:$true] %s30_s27 }
   0x6   :  { %s190_s29 = smov 8  }
   0x7   :  { %36 = dma.hbm_to_vmem [thread:$0]  %s29_s25, 512, %s31_s27, [#allocation6], %s189_s28, %s189_s28, %s190_s29  }
   0x8   :  { %183 = dma.done.wait [#allocation4], 128  }
   0x9   :  { %184 = vsyncadd [#allocation4], 4294967168 }
   0xa   :  { %185 = dma.done.wait [#allocation6], 512  }
   0xb   :  { %186 = vsyncadd [#allocation6], 4294966784  ;;  %v55_v0 = vld [vmem:[#allocation5 + $0x18] sm:$0xff]  ;;  %v54_v1 = vld [vmem:[#allocation5 + $0x10] sm:$0xff]  ;;  %vm60_vm0 = vcmask 261120   ;;  %v94_v12 = vstv %s243_s4  ;;  %vm115_vm4 = vcmask 7168  }
   0xc   :  { %76 = vmatpush.msra.mxu0 %v55_v0  ;;  %v53_v2 = vld [vmem:[#allocation5 + $0x8] sm:$0xff]  ;;  %v52_v3 = vld [vmem:[#allocation5] sm:$0xff]  ;;  %v51_v4 = vld [vmem:[#allocation3] sm:$0xff] }
   0xd   :  { %v129_v5 = vld [vmem:[%s241_s2] ss:$0 sm:$0xff] }
   0xe   :  { %77 = vmatpush.msra.mxu0 %v54_v1  ;;  %v130_v8 = vld [vmem:[%s242_s3] ss:$0 sm:$0xff] }
  0x10   :  { %78 = vmatpush.msra.mxu0 %v53_v2 }
  0x12   :  { %79 = vmatpush.msra.mxu0 %v52_v3 }
  0x13   :  { %123 = vmatmul.msk.f32.vlgmr.msra.gmra.mxu0 %vm60_vm0, %v51_v4 }
  0x90   :  { %v81_v6 = vpop.f32.mrf.mxu0 }
  0x91   :  { %v82_v7 = vadd.f32 %v129_v5, %v81_v6 }
  0x93   :  { %v84_v9 = vmax.f32 %v82_v7, 0.0 }
  0x95   :  { %v89_v10 = vmul.f32 %v130_v8, %v84_v9 }
  0x97   :  { %v90_v11 = vsel %vm60_vm0, %v89_v10, 0.0 }
  0x98   :  { %91 = vadd.xlane.f32.xlu0 %v90_v11 }
 0x10b   :  { %v92_v13 = vpop.xlane.xlu0 %91 }
 0x10c   :  { %v95_v14 = vadd.f32 %v94_v12, %v92_v13 }
 0x10e   :  { %v124_v15 = vmul.f32 -1.442695, %v95_v14 }
 0x110   :  { %131 = vpow2.f32 %v124_v15 }
 0x116   :  { %v132_v16 = vpop.eup %131 }
 0x117   :  { %v99_v17 = vadd.f32 1.0, %v132_v16 }
 0x119   :  { %133 = vrcp.f32 %v99_v17  ;;  %v111_v21 = vand.u32 2147483648, %v99_v17  ;;  %v109_v23 = vand.u32 2147483647, %v99_v17  ;;  %vm105_vm2 = vweird.f32 %v99_v17 }
 0x11b   :  { %v112_v25 = vor.u32 1.1754944e-38, %v111_v21  ;;  %vm110_vm5 = vcmp.eq.f32.partialorder %v109_v23, 8.507059e+37 }
 0x11f   :  { %v134_v18 = vpop.eup %133 }
 0x120   :  { %v101_v19 = vmul.f32 %v134_v18, %v99_v17  ;;  %vm106_vm1 = vweird.f32 %v134_v18 }
 0x121   :  { %vm107_vm3 = vmor %vm105_vm2, %vm106_vm1 }
 0x122   :  { %v102_v20 = vsub.f32 1.0, %v101_v19 }
 0x124   :  { %v103_v22 = vmul.f32 %v134_v18, %v102_v20 }
 0x126   :  { %v104_v24 = vadd.f32 %v134_v18, %v103_v22 }
 0x128   :  { %v108_v26 = vsel %vm107_vm3, %v134_v18, %v104_v24 }
 0x129   :  { %v113_v27 = vsel %vm110_vm5, %v112_v25, %v108_v26 }
 0x12a   :  { %116 = vst.msk [vmem:[%s244_s5] sm:$0xff] %vm115_vm4, %v113_v27 }
 0x12b   :  { %121 = vsyncpa [#allocation4], 1 }
 0x12c   :  { %122 = vsyncpa [#allocation6], 1 }

</bundles_post_ra>
